<compile_context>
chip_gen: v6e
topology: v6e:2x2x1
jax: 0.10.0
libtpu: 0.0.40
codegen_flags: <defaults>
</compile_context>

<pallas_src>
import jax
import jax.numpy as jnp
from jax.experimental import pallas as pl
from jax.experimental.pallas import tpu as pltpu

D_IN, H1, H2, D_OUT = 28 * 28, 128, 64, 10
H2P, D_OUTP = 128, 128          # lane-dense padded tail widths
BN_EPS = 1e-5


def fnn_kernel(x_ref, w1_ref, b1_ref, w2_ref, b2_ref, w3_ref, b3_ref, o_ref):
    # fc1 + relu   (MXU, f32 accumulation)
    h = jnp.dot(x_ref[...], w1_ref[...], preferred_element_type=jnp.float32) + b1_ref[...]
    h = jnp.maximum(h, 0.0)
    # (BatchNorm already folded into w2/b2; dropout is identity in eval mode)
    # fc2 + relu
    h = jnp.dot(h, w2_ref[...], preferred_element_type=jnp.float32) + b2_ref[...]
    h = jnp.maximum(h, 0.0)
    # fc3 (logits, padded to 128 lanes)
    o_ref[...] = jnp.dot(h, w3_ref[...], preferred_element_type=jnp.float32) + b3_ref[...]


def _fold_and_pad_params(params):
    """Fold eval-mode BN into fc2 and zero-pad the narrow tail to 128 lanes."""
    w1, b1, gamma, beta, mu, var, w2, b2, w3, b3 = params

    # BN (inference) fold: y = (h - mu) * rsqrt(var+eps) * gamma + beta = h*scale + shift
    scale = (gamma * jax.lax.rsqrt(var + BN_EPS)).reshape(H1)      # (H1,)
    shift = (beta - mu * gamma * jax.lax.rsqrt(var + BN_EPS)).reshape(1, H1)
    w2f = scale[:, None] * w2                                       # (H1, H2)
    b2f = shift @ w2 + b2                                           # (1, H2)

    # Pad H2 -> 128 (extra fc2 columns are 0, relu(0)=0, matching zero w3 rows)
    w2p = jnp.zeros((H1, H2P), jnp.float32).at[:, :H2].set(w2f)
    b2p = jnp.zeros((1, H2P), jnp.float32).at[:, :H2].set(b2f)
    # Pad D_OUT -> 128 (extra logits are garbage-free zeros, sliced off outside)
    w3p = jnp.zeros((H2P, D_OUTP), jnp.float32).at[:H2, :D_OUT].set(w3)
    b3p = jnp.zeros((1, D_OUTP), jnp.float32).at[:, :D_OUT].set(b3)

    return w1, b1, w2p, b2p, w3p, b3p


def fnn_forward(x, params, *, tb=512):
    """x: (B, 784) float32. params: PyTorch-equivalent FNN params (see init_params)."""
    B = x.shape[0]
    w1, b1, w2p, b2p, w3p, b3p = _fold_and_pad_params(params)

    # Effective batch tile: multiple of 8 (sublanes), no bigger than the (rounded) batch.
    b_rounded = 8 * pl.cdiv(B, 8)
    tb_eff = min(tb, b_rounded)
    tb_eff = 8 * pl.cdiv(tb_eff, 8)
    n_tiles = pl.cdiv(B, tb_eff)
    b_pad = n_tiles * tb_eff
    if b_pad != B:
        x = jnp.pad(x, ((0, b_pad - B), (0, 0)))

    def full(shape):
        # whole (small) parameter tensor resident in VMEM for every batch tile
        return pl.BlockSpec(shape, lambda i: (0, 0))

    out = pl.pallas_call(
        fnn_kernel,
        out_shape=jax.ShapeDtypeStruct((b_pad, D_OUTP), jnp.float32),
        grid_spec=pltpu.PrefetchScalarGridSpec(
            num_scalar_prefetch=0,
            grid=(n_tiles,),
            in_specs=[
                pl.BlockSpec((tb_eff, D_IN), lambda i: (i, 0)),   # x batch tile
                full((D_IN, H1)), full((1, H1)),                  # fc1 W, b
                full((H1, H2P)), full((1, H2P)),                  # fc2 W', b' (BN folded, padded)
                full((H2P, D_OUTP)), full((1, D_OUTP)),           # fc3 W, b   (padded)
            ],
            out_specs=pl.BlockSpec((tb_eff, D_OUTP), lambda i: (i, 0)),
        ),
        compiler_params=pltpu.CompilerParams(
            dimension_semantics=("parallel",)),   # batch tiles shard across TCs on v7x
    )(x, w1, b1, w2p, b2p, w3p, b3p)

    return out[:B, :D_OUT]


def init_params(key):
    """PyTorch-equivalent FNN parameters; linear weights pre-transposed to (in, out)."""
    ks = jax.random.split(key, 8)
    s1, s2, s3 = 1.0 / jnp.sqrt(D_IN), 1.0 / jnp.sqrt(H1), 1.0 / jnp.sqrt(H2)
    w1 = jax.random.uniform(ks[0], (D_IN, H1), jnp.float32, -s1, s1)
    b1 = jax.random.uniform(ks[1], (1, H1), jnp.float32, -s1, s1)
    gamma = jnp.ones((1, H1), jnp.float32) + 0.05 * jax.random.normal(ks[2], (1, H1))
    beta = 0.05 * jax.random.normal(ks[3], (1, H1))
    mu = 0.1 * jax.random.normal(ks[4], (1, H1))
    var = jax.random.uniform(ks[5], (1, H1), jnp.float32, 0.5, 1.5)
    w2 = jax.random.uniform(ks[6], (H1, H2), jnp.float32, -s2, s2)
    b2 = jnp.zeros((1, H2), jnp.float32)
    w3 = jax.random.uniform(ks[7], (H2, D_OUT), jnp.float32, -s3, s3)
    b3 = jnp.zeros((1, D_OUT), jnp.float32)
    return (w1, b1, gamma, beta, mu, var, w2, b2, w3, b3)


def fnn_reference(x, params):
    w1, b1, g, beta, mu, var, w2, b2, w3, b3 = params
    h = jnp.maximum(x @ w1 + b1, 0.0)
    h = (h - mu) * jax.lax.rsqrt(var + BN_EPS) * g + beta
    h = jnp.maximum(h @ w2 + b2, 0.0)
    return h @ w3 + b3


if __name__ == "__main__":
    key = jax.random.PRNGKey(0)
    kx, kp, kx2 = jax.random.split(key, 3)
    params = init_params(kp)

    # Small deterministic check (batch=8).
    x = jax.random.normal(kx, (8, D_IN), jnp.float32)
    out = jax.block_until_ready(fnn_forward(x, params))
    ref = fnn_reference(x, params)
    assert out.shape == (8, D_OUT)
    assert jnp.allclose(out, ref, atol=1e-4, rtol=1e-4), "mismatch vs reference (B=8)"

    # Non-multiple batch to exercise the pad-and-slice grid path.
    x2 = jax.random.normal(kx2, (200, D_IN), jnp.float32)
    out2 = jax.block_until_ready(fnn_forward(x2, params, tb=128))
    ref2 = fnn_reference(x2, params)
    assert out2.shape == (200, D_OUT)
    assert jnp.allclose(out2, ref2, atol=1e-4, rtol=1e-4), "mismatch vs reference (B=200)"

    print("KERNEL_OK")
</pallas_src>

<mosaic_0001>
module attributes {stable_mosaic.version = 11 : i64} {
  func.func @fnn_kernel(%arg0: i32, %arg1: memref<8x784xf32, #tpu.memory_space<vmem>>, %arg2: memref<784x128xf32, #tpu.memory_space<vmem>>, %arg3: memref<1x128xf32, #tpu.memory_space<vmem>>, %arg4: memref<128x128xf32, #tpu.memory_space<vmem>>, %arg5: memref<1x128xf32, #tpu.memory_space<vmem>>, %arg6: memref<128x128xf32, #tpu.memory_space<vmem>>, %arg7: memref<1x128xf32, #tpu.memory_space<vmem>>, %arg8: memref<8x128xf32, #tpu.memory_space<vmem>>) attributes {dimension_semantics = [#tpu.dimension_semantics<parallel>], iteration_bounds = array<i64: 1>, scalar_prefetch = 0 : i64, scratch_operands = 0 : i64, tpu.core_type = #tpu.core_type<tc>, window_params = [{transform_indices = @transform_0, window_bounds = array<i64: 8, 784>}, {pipeline_mode = #tpu.pipeline_mode<synchronous>, transform_indices = @transform_1, window_bounds = array<i64: 784, 128>}, {pipeline_mode = #tpu.pipeline_mode<synchronous>, transform_indices = @transform_2, window_bounds = array<i64: 1, 128>}, {pipeline_mode = #tpu.pipeline_mode<synchronous>, transform_indices = @transform_3, window_bounds = array<i64: 128, 128>}, {pipeline_mode = #tpu.pipeline_mode<synchronous>, transform_indices = @transform_4, window_bounds = array<i64: 1, 128>}, {pipeline_mode = #tpu.pipeline_mode<synchronous>, transform_indices = @transform_5, window_bounds = array<i64: 128, 128>}, {pipeline_mode = #tpu.pipeline_mode<synchronous>, transform_indices = @transform_6, window_bounds = array<i64: 1, 128>}, {transform_indices = @transform_7, window_bounds = array<i64: 8, 128>}]} {
    %c0 = arith.constant 0 : index
    %c0_0 = arith.constant 0 : index
    %0 = vector.load %arg1[%c0, %c0_0] : memref<8x784xf32, #tpu.memory_space<vmem>>, vector<8x784xf32>
    %c0_1 = arith.constant 0 : index
    %c0_2 = arith.constant 0 : index
    %1 = vector.load %arg2[%c0_1, %c0_2] : memref<784x128xf32, #tpu.memory_space<vmem>>, vector<784x128xf32>
    %cst = arith.constant dense<0.000000e+00> : vector<8x128xf32>
    %2 = tpu.matmul %0, %1, %cst {dimension_numbers = #tpu.dot_dimension_numbers<[1], [0], [0], [1], [0, 0, 1, 1], [], []>} : vector<8x784xf32>, vector<784x128xf32>, vector<8x128xf32> -> vector<8x128xf32>
    %c0_3 = arith.constant 0 : index
    %c0_4 = arith.constant 0 : index
    %3 = vector.load %arg3[%c0_3, %c0_4] : memref<1x128xf32, #tpu.memory_space<vmem>>, vector<1x128xf32>
    %4 = vector.broadcast %3 : vector<1x128xf32> to vector<8x128xf32>
    %5 = arith.addf %2, %4 : vector<8x128xf32>
    %cst_5 = arith.constant 0.000000e+00 : f32
    %6 = vector.broadcast %cst_5 : f32 to vector<8x128xf32>
    %7 = arith.maximumf %5, %6 : vector<8x128xf32>
    %c0_6 = arith.constant 0 : index
    %c0_7 = arith.constant 0 : index
    %8 = vector.load %arg4[%c0_6, %c0_7] : memref<128x128xf32, #tpu.memory_space<vmem>>, vector<128x128xf32>
    %cst_8 = arith.constant dense<0.000000e+00> : vector<8x128xf32>
    %9 = tpu.matmul %7, %8, %cst_8 {dimension_numbers = #tpu.dot_dimension_numbers<[1], [0], [0], [1], [0, 0, 1, 1], [], []>} : vector<8x128xf32>, vector<128x128xf32>, vector<8x128xf32> -> vector<8x128xf32>
    %c0_9 = arith.constant 0 : index
    %c0_10 = arith.constant 0 : index
    %10 = vector.load %arg5[%c0_9, %c0_10] : memref<1x128xf32, #tpu.memory_space<vmem>>, vector<1x128xf32>
    %11 = vector.broadcast %10 : vector<1x128xf32> to vector<8x128xf32>
    %12 = arith.addf %9, %11 : vector<8x128xf32>
    %cst_11 = arith.constant 0.000000e+00 : f32
    %13 = vector.broadcast %cst_11 : f32 to vector<8x128xf32>
    %14 = arith.maximumf %12, %13 : vector<8x128xf32>
    %c0_12 = arith.constant 0 : index
    %c0_13 = arith.constant 0 : index
    %15 = vector.load %arg6[%c0_12, %c0_13] : memref<128x128xf32, #tpu.memory_space<vmem>>, vector<128x128xf32>
    %cst_14 = arith.constant dense<0.000000e+00> : vector<8x128xf32>
    %16 = tpu.matmul %14, %15, %cst_14 {dimension_numbers = #tpu.dot_dimension_numbers<[1], [0], [0], [1], [0, 0, 1, 1], [], []>} : vector<8x128xf32>, vector<128x128xf32>, vector<8x128xf32> -> vector<8x128xf32>
    %c0_15 = arith.constant 0 : index
    %c0_16 = arith.constant 0 : index
    %17 = vector.load %arg7[%c0_15, %c0_16] : memref<1x128xf32, #tpu.memory_space<vmem>>, vector<1x128xf32>
    %18 = vector.broadcast %17 : vector<1x128xf32> to vector<8x128xf32>
    %19 = arith.addf %16, %18 : vector<8x128xf32>
    %c0_17 = arith.constant 0 : index
    %c0_18 = arith.constant 0 : index
    %20 = vector.load %arg8[%c0_17, %c0_18] : memref<8x128xf32, #tpu.memory_space<vmem>>, vector<8x128xf32>
    tpu.vector_store %arg8[%c0_17, %c0_18], %19 {strides = array<i32>} : memref<8x128xf32, #tpu.memory_space<vmem>>, vector<8x128xf32>,
    return
  }
  func.func @transform_0(%arg0: i32) -> (i32, i32) {
    %c0_i32 = arith.constant 0 : i32
    %c0_i32_0 = arith.constant 0 : i32
    return %arg0, %c0_i32 : i32, i32
  }
  func.func @transform_1(%arg0: i32) -> (i32, i32) {
    %c0_i32 = arith.constant 0 : i32
    %c0_i32_0 = arith.constant 0 : i32
    %c0_i32_1 = arith.constant 0 : i32
    return %c0_i32, %c0_i32_0 : i32, i32
  }
  func.func @transform_2(%arg0: i32) -> (i32, i32) {
    %c0_i32 = arith.constant 0 : i32
    %c0_i32_0 = arith.constant 0 : i32
    %c0_i32_1 = arith.constant 0 : i32
    return %c0_i32, %c0_i32_0 : i32, i32
  }
  func.func @transform_3(%arg0: i32) -> (i32, i32) {
    %c0_i32 = arith.constant 0 : i32
    %c0_i32_0 = arith.constant 0 : i32
    %c0_i32_1 = arith.constant 0 : i32
    return %c0_i32, %c0_i32_0 : i32, i32
  }
  func.func @transform_4(%arg0: i32) -> (i32, i32) {
    %c0_i32 = arith.constant 0 : i32
    %c0_i32_0 = arith.constant 0 : i32
    %c0_i32_1 = arith.constant 0 : i32
    return %c0_i32, %c0_i32_0 : i32, i32
  }
  func.func @transform_5(%arg0: i32) -> (i32, i32) {
    %c0_i32 = arith.constant 0 : i32
    %c0_i32_0 = arith.constant 0 : i32
    %c0_i32_1 = arith.constant 0 : i32
    return %c0_i32, %c0_i32_0 : i32, i32
  }
  func.func @transform_6(%arg0: i32) -> (i32, i32) {
    %c0_i32 = arith.constant 0 : i32
    %c0_i32_0 = arith.constant 0 : i32
    %c0_i32_1 = arith.constant 0 : i32
    return %c0_i32, %c0_i32_0 : i32, i32
  }
  func.func @transform_7(%arg0: i32) -> (i32, i32) {
    %c0_i32 = arith.constant 0 : i32
    %c0_i32_0 = arith.constant 0 : i32
    return %arg0, %c0_i32 : i32, i32
  }
}

</mosaic_0001>

<bundles_post_ra>
// kernel: tpu_custom_call.1
= control target key start
LH: loop header
LB: loop body
LE: loop exit
PB: predicated region body
PF: predicated region fallthrough
CT: control target
= control target key end

     0   :  { %12 = vsyncpa [#allocation3], 0  ;;  %s1144_s0 = inlined_call_operand.hbm [shape: f32[8,784], index: 0, kind: input, shape index: {}]   ;;  %s1145_s1 = inlined_call_operand.hbm [shape: f32[784,128], index: 1, kind: input, shape index: {}]   ;;  %s1146_s2 = inlined_call_operand.vmem [shape: f32[1,128], index: 2, kind: input, shape index: {}]   ;;  %s1147_s3 = inlined_call_operand.hbm [shape: f32[128,128], index: 3, kind: input, shape index: {}]   ;;  %s1148_s4 = inlined_call_operand.vmem [shape: f32[1,128], index: 4, kind: input, shape index: {}]   ;;  %s1149_s5 = inlined_call_operand.hbm [shape: f32[128,128], index: 5, kind: input, shape index: {}]   ;;  %s1150_s6 = inlined_call_operand.vmem [shape: f32[1,128], index: 6, kind: input, shape index: {}]   ;;  %s1151_s7 = inlined_call_operand.hbm [shape: f32[8,128], index: 7, kind: output, shape index: {}]  }
   0x1   :  { %13 = vsyncpa [#allocation6], 0 }
   0x2   :  { %14 = vsyncpa [#allocation9], 0 }
   0x3   :  { %15 = vsyncpa [#allocation4], 0  ;;  %s1022_s24 = smov [#allocation5]  }
   0x4   :  { %s31_s25 = sshll.u32 %s1022_s24, 4  ;;  %s32_s25 = int_to_ptr.vmem [resolvable:$true] %s31_s25 }
   0x5   :  { %s922_s26 = scalar_lea.vmem %s32_s25, 12544  ;;  %p927_p1 = scmp.lt.s32.totalorder %s32_s25, %s32_s25 }
   0x6   :  { %p923_p0 = scmp.ne.s32.totalorder %s32_s25, %s922_s26  ;;  %p928_p2 = scmp.lt.s32.totalorder %s922_s26, %s922_s26 }
   0x8   :  { %p929_p3 = por %p928_p2, %p927_p1 }
   0xa   :  { %p930_p4 = pnand %p929_p3, %p923_p0 }
   0xc   :  { %933 = shalt.err (!%p930_p4)
}
   0xd   :  { %s1023_s27 = smov 128   ;;  %s1024_s28 = smov 8  }
   0xe   :  { %37 = dma.hbm_to_vmem [thread:$0]  %s1145_s1, 12544, %s32_s25, [#allocation6], %s1023_s27, %s1023_s27, %s1024_s28  }
   0xf   :  { %s1025_s8 = smov [#allocation2]   ;;  %s1026_s10 = smov [#allocation7]  }
  0x10   :  { %s22_s9 = sshll.u32 %s1025_s8, 4  ;;  %s45_s11 = sshll.u32 %s1026_s10, 4  ;;  %s23_s9 = int_to_ptr.vmem [resolvable:$true] %s22_s9  ;;  %s46_s11 = int_to_ptr.vmem [resolvable:$true] %s45_s11 }
  0x11   :  { %s942_s12 = scalar_lea.vmem %s23_s9, 896  ;;  %p947_p6 = scmp.lt.s32.totalorder %s23_s9, %s23_s9 }
  0x12   :  { %p943_p5 = scmp.ne.s32.totalorder %s23_s9, %s942_s12  ;;  %p948_p7 = scmp.lt.s32.totalorder %s942_s12, %s942_s12 }
  0x14   :  { %p949_p8 = por %p948_p7, %p947_p6 }
  0x16   :  { %p950_p9 = pnand %p949_p8, %p943_p5 }
  0x18   :  { %953 = shalt.err (!%p950_p9)
}
  0x19   :  { %25 = dma.hbm_to_vmem [thread:$0]  %s1144_s0, 896, %s23_s9, [#allocation3]  }
  0x1a   :  { %s962_s15 = scalar_lea.vmem %s46_s11, 2048  ;;  %p967_p11 = scmp.lt.s32.totalorder %s46_s11, %s46_s11 }
  0x1b   :  { %p963_p10 = scmp.ne.s32.totalorder %s46_s11, %s962_s15  ;;  %p968_p12 = scmp.lt.s32.totalorder %s962_s15, %s962_s15 }
  0x1d   :  { %p969_p13 = por %p968_p12, %p967_p11 }
  0x1f   :  { %p970_p0 = pnand %p969_p13, %p963_p10 }
  0x21   :  { %973 = shalt.err (!%p970_p0)
}
  0x22   :  { %51 = dma.hbm_to_vmem [thread:$0]  %s1147_s3, 2048, %s46_s11, [#allocation6], %s1023_s27, %s1023_s27, %s1024_s28  }
  0x23   :  { %s1027_s17 = smov [#allocation8]  }
  0x24   :  { %s59_s18 = sshll.u32 %s1027_s17, 4  ;;  %s60_s18 = int_to_ptr.vmem [resolvable:$true] %s59_s18 }
  0x25   :  { %s982_s19 = scalar_lea.vmem %s60_s18, 2048  ;;  %p987_p2 = scmp.lt.s32.totalorder %s60_s18, %s60_s18 }
  0x26   :  { %p983_p1 = scmp.ne.s32.totalorder %s60_s18, %s982_s19  ;;  %p988_p3 = scmp.lt.s32.totalorder %s982_s19, %s982_s19 }
  0x28   :  { %p989_p4 = por %p988_p3, %p987_p2 }
  0x2a   :  { %p990_p5 = pnand %p989_p4, %p983_p1 }
  0x2c   :  { %993 = shalt.err (!%p990_p5)
}
  0x2d   :  { %65 = dma.hbm_to_vmem [thread:$0]  %s1149_s5, 2048, %s60_s18, [#allocation9], %s1023_s27, %s1023_s27, %s1024_s28  }
  0x2e   :  { %1014 = dma.done.wait [#allocation3], 896  }
  0x2f   :  { %1015 = vsyncadd [#allocation3], 4294966400 }
  0x30   :  { %1016 = dma.done.wait [#allocation6], 14592  }
  0x31   :  { %1017 = vsyncadd [#allocation6], 4294952704 }
  0x32   :  { %1018 = dma.done.wait [#allocation9], 2048  }
  0x33   :  { %1019 = vsyncadd [#allocation9], 4294965248  ;;  %v118_v0 = vld [vmem:[#allocation5 + $0xf8] sm:$0xff]  ;;  %v117_v2 = vld [vmem:[#allocation5 + $0xf0] sm:$0xff]  ;;  %vm192_vm0 = vcmask 130048   ;;  %vm1029_vm1 = vmmov 0  }
  0x34   :  { %v102_v1 = vld [vmem:[#allocation5 + $0x78] sm:$0xff]  ;;  %686 = vmatprep.subr.mxu0 %v118_v0  ;;  %v101_v4 = vld [vmem:[#allocation5 + $0x70] sm:$0xff]  ;;  %v116_v6 = vld [vmem:[#allocation5 + $0xe8] sm:$0xff]  ;;  %s1030_s24 = smov [#allocation10]  }
  0x35   :  { %v150_v3 = vld [vmem:[#allocation5 + $0x1f8] sm:$0xff]  ;;  %687 = vmatpush3.msra.mxu0 %v102_v1  ;;  %v149_v7 = vld [vmem:[#allocation5 + $0x1f0] sm:$0xff]  ;;  %v100_v8 = vld [vmem:[#allocation5 + $0x68] sm:$0xff]  ;;  %s671_s25 = sshll.u32 %s1030_s24, 4  ;;  %s672_s25 = int_to_ptr.vmem [resolvable:$true] %s671_s25 }
  0x36   :  { %v134_v5 = vld [vmem:[#allocation5 + $0x178] sm:$0xff]  ;;  %721 = vmatprep.subr.mxu1 %v150_v3  ;;  %688 = vmatprep.subr.mxu0 %v117_v2  ;;  %v133_v9 = vld [vmem:[#allocation5 + $0x170] sm:$0xff]  ;;  %v148_v10 = vld [vmem:[#allocation5 + $0x1e8] sm:$0xff]  ;;  %s994_s26 = scalar_lea.vmem %s672_s25, 128  ;;  %p999_p7 = scmp.lt.s32.totalorder %s672_s25, %s672_s25 }
  0x37   :  { %722 = vmatpush3.msra.mxu1 %v134_v5  ;;  %689 = vmatpush3.msra.mxu0 %v101_v4  ;;  %v115_v11 = vld [vmem:[#allocation5 + $0xe0] sm:$0xff]  ;;  %v132_v12 = vld [vmem:[#allocation5 + $0x168] sm:$0xff]  ;;  %v114_v15 = vld [vmem:[#allocation5 + $0xd8] sm:$0xff]  ;;  %p995_p6 = scmp.ne.s32.totalorder %s672_s25, %s994_s26  ;;  %p1000_p8 = scmp.lt.s32.totalorder %s994_s26, %s994_s26 }
  0x38   :  { %723 = vmatprep.subr.mxu1 %v149_v7  ;;  %690 = vmatprep.subr.mxu0 %v116_v6  ;;  %v99_v13 = vld [vmem:[#allocation5 + $0x60] sm:$0xff]  ;;  %v98_v17 = vld [vmem:[#allocation5 + $0x58] sm:$0xff]  ;;  %v113_v19 = vld [vmem:[#allocation5 + $0xd0] sm:$0xff] }
  0x39   :  { %724 = vmatpush3.msra.mxu1 %v133_v9  ;;  %v147_v14 = vld [vmem:[#allocation5 + $0x1e0] sm:$0xff]  ;;  %691 = vmatpush3.msra.mxu0 %v100_v8  ;;  %v146_v18 = vld [vmem:[#allocation5 + $0x1d8] sm:$0xff]  ;;  %v97_v21 = vld [vmem:[#allocation5 + $0x50] sm:$0xff]  ;;  %p1001_p9 = por %p1000_p8, %p999_p7 }
  0x3a   :  { %725 = vmatprep.subr.mxu1 %v148_v10  ;;  %v131_v16 = vld [vmem:[#allocation5 + $0x160] sm:$0xff]  ;;  %692 = vmatprep.subr.mxu0 %v115_v11  ;;  %v130_v20 = vld [vmem:[#allocation5 + $0x158] sm:$0xff]  ;;  %v145_v22 = vld [vmem:[#allocation5 + $0x1d0] sm:$0xff] }
  0x3b   :  { %726 = vmatpush3.msra.mxu1 %v132_v12  ;;  %693 = vmatpush3.msra.mxu0 %v99_v13  ;;  %v112_v23 = vld [vmem:[#allocation5 + $0xc8] sm:$0xff]  ;;  %v129_v24 = vld [vmem:[#allocation5 + $0x150] sm:$0xff]  ;;  %v111_v27 = vld [vmem:[#allocation5 + $0xc0] sm:$0xff]  ;;  %p1002_p10 = pnand %p1001_p9, %p995_p6 }
  0x3c   :  { %727 = vmatprep.subr.mxu1 %v147_v14  ;;  %694 = vmatprep.subr.mxu0 %v114_v15  ;;  %v96_v25 = vld [vmem:[#allocation5 + $0x48] sm:$0xff]  ;;  %v95_v29 = vld [vmem:[#allocation5 + $0x40] sm:$0xff]  ;;  %v110_v31 = vld [vmem:[#allocation5 + $0xb8] sm:$0xff]  ;;  %v1028_v14 = vmov 0.0  }
  0x3d   :  { %728 = vmatpush3.msra.mxu1 %v131_v16  ;;  %695 = vmatpush3.msra.mxu0 %v98_v17  ;;  %v144_v26 = vld [vmem:[#allocation5 + $0x1c8] sm:$0xff]  ;;  %v143_v30 = vld [vmem:[#allocation5 + $0x1c0] sm:$0xff]  ;;  %v94_v33 = vld [vmem:[#allocation5 + $0x38] sm:$0xff] }
  0x3e   :  { %729 = vmatprep.subr.mxu1 %v146_v18  ;;  %696 = vmatprep.subr.mxu0 %v113_v19  ;;  %v128_v28 = vld [vmem:[#allocation5 + $0x148] sm:$0xff]  ;;  %v127_v32 = vld [vmem:[#allocation5 + $0x140] sm:$0xff]  ;;  %v142_v34 = vld [vmem:[#allocation5 + $0x1b8] sm:$0xff] }
  0x3f   :  { %730 = vmatpush3.msra.mxu1 %v130_v20  ;;  %697 = vmatpush3.msra.mxu0 %v97_v21  ;;  %v109_v35 = vld [vmem:[#allocation5 + $0xb0] sm:$0xff]  ;;  %v126_v36 = vld [vmem:[#allocation5 + $0x138] sm:$0xff]  ;;  %v108_v39 = vld [vmem:[#allocation5 + $0xa8] sm:$0xff] }
  0x40   :  { %731 = vmatprep.subr.mxu1 %v145_v22  ;;  %698 = vmatprep.subr.mxu0 %v112_v23  ;;  %v93_v37 = vld [vmem:[#allocation5 + $0x30] sm:$0xff]  ;;  %v92_v41 = vld [vmem:[#allocation5 + $0x28] sm:$0xff]  ;;  %v107_v43 = vld [vmem:[#allocation5 + $0xa0] sm:$0xff] }
  0x41   :  { %732 = vmatpush3.msra.mxu1 %v129_v24  ;;  %699 = vmatpush3.msra.mxu0 %v96_v25  ;;  %v141_v38 = vld [vmem:[#allocation5 + $0x1b0] sm:$0xff]  ;;  %v140_v42 = vld [vmem:[#allocation5 + $0x1a8] sm:$0xff]  ;;  %v91_v45 = vld [vmem:[#allocation5 + $0x20] sm:$0xff] }
  0x42   :  { %733 = vmatprep.subr.mxu1 %v144_v26  ;;  %700 = vmatprep.subr.mxu0 %v111_v27  ;;  %v125_v40 = vld [vmem:[#allocation5 + $0x130] sm:$0xff]  ;;  %v124_v44 = vld [vmem:[#allocation5 + $0x128] sm:$0xff]  ;;  %v139_v46 = vld [vmem:[#allocation5 + $0x1a0] sm:$0xff] }
  0x43   :  { %734 = vmatpush3.msra.mxu1 %v128_v28  ;;  %701 = vmatpush3.msra.mxu0 %v95_v29  ;;  %v106_v47 = vld [vmem:[#allocation5 + $0x98] sm:$0xff]  ;;  %v123_v48 = vld [vmem:[#allocation5 + $0x120] sm:$0xff]  ;;  %v105_v51 = vld [vmem:[#allocation5 + $0x90] sm:$0xff] }
  0x44   :  { %735 = vmatprep.subr.mxu1 %v143_v30  ;;  %702 = vmatprep.subr.mxu0 %v110_v31  ;;  %v90_v49 = vld [vmem:[#allocation5 + $0x18] sm:$0xff]  ;;  %v89_v53 = vld [vmem:[#allocation5 + $0x10] sm:$0xff]  ;;  %v104_v55 = vld [vmem:[#allocation5 + $0x88] sm:$0xff] }
  0x45   :  { %736 = vmatpush3.msra.mxu1 %v127_v32  ;;  %703 = vmatpush3.msra.mxu0 %v94_v33  ;;  %v138_v50 = vld [vmem:[#allocation5 + $0x198] sm:$0xff]  ;;  %v137_v54 = vld [vmem:[#allocation5 + $0x190] sm:$0xff]  ;;  %v88_v57 = vld [vmem:[#allocation5 + $0x8] sm:$0xff] }
  0x46   :  { %737 = vmatprep.subr.mxu1 %v142_v34  ;;  %704 = vmatprep.subr.mxu0 %v109_v35  ;;  %v122_v52 = vld [vmem:[#allocation5 + $0x118] sm:$0xff]  ;;  %v121_v56 = vld [vmem:[#allocation5 + $0x110] sm:$0xff]  ;;  %v136_v58 = vld [vmem:[#allocation5 + $0x188] sm:$0xff] }
  0x47   :  { %738 = vmatpush3.msra.mxu1 %v126_v36  ;;  %705 = vmatpush3.msra.mxu0 %v93_v37  ;;  %v103_v59 = vld [vmem:[#allocation5 + $0x80] sm:$0xff]  ;;  %v81_v60 = vld [vmem:[#allocation2 + $0x8] sm:$0xff]  ;;  %v120_v62 = vld [vmem:[#allocation5 + $0x108] sm:$0xff] }
  0x48   :  { %739 = vmatprep.subr.mxu1 %v141_v38  ;;  %706 = vmatprep.subr.mxu0 %v108_v39  ;;  %v87_v61 = vld [vmem:[#allocation5] sm:$0xff]  ;;  %v80_v63 = vld [vmem:[#allocation2] sm:$0xff]  ;;  %v182_v1 = vld [vmem:[#allocation5 + $0x2f8] sm:$0xff] }
  0x49   :  { %740 = vmatpush3.msra.mxu1 %v125_v40  ;;  %707 = vmatpush3.msra.mxu0 %v92_v41  ;;  %v135_v0 = vld [vmem:[#allocation5 + $0x180] sm:$0xff]  ;;  %v166_v4 = vld [vmem:[#allocation5 + $0x278] sm:$0xff]  ;;  %v181_v6 = vld [vmem:[#allocation5 + $0x2f0] sm:$0xff] }
  0x4a   :  { %741 = vmatprep.subr.mxu1 %v140_v42  ;;  %708 = vmatprep.subr.mxu0 %v107_v43  ;;  %v119_v2 = vld [vmem:[#allocation5 + $0x100] sm:$0xff]  ;;  %v82_v5 = vld [vmem:[#allocation2 + $0x10] sm:$0xff]  ;;  %v165_v7 = vld [vmem:[#allocation5 + $0x270] sm:$0xff] }
  0x4b   :  { %742 = vmatpush3.msra.mxu1 %v124_v44  ;;  %709 = vmatpush3.msra.mxu0 %v91_v45  ;;  %v83_v3 = vld [vmem:[#allocation2 + $0x18] sm:$0xff]  ;;  %v85_v8 = vld [vmem:[#allocation2 + $0x28] sm:$0xff]  ;;  %v180_v9 = vld [vmem:[#allocation5 + $0x2e8] sm:$0xff] }
  0x4c   :  { %743 = vmatprep.subr.mxu1 %v139_v46  ;;  %710 = vmatprep.subr.mxu0 %v106_v47  ;;  %v164_v10 = vld [vmem:[#allocation5 + $0x268] sm:$0xff]  ;;  %v179_v12 = vld [vmem:[#allocation5 + $0x2e0] sm:$0xff]  ;;  %v178_v16 = vld [vmem:[#allocation5 + $0x2d8] sm:$0xff] }
  0x4d   :  { %744 = vmatpush3.msra.mxu1 %v123_v48  ;;  %711 = vmatpush3.msra.mxu0 %v90_v49  ;;  %v184_v11 = vld [vmem:[#allocation5 + $0x308] sm:$0xff]  ;;  %v163_v13 = vld [vmem:[#allocation5 + $0x260] sm:$0xff]  ;;  %v162_v17 = vld [vmem:[#allocation5 + $0x258] sm:$0xff] }
  0x4e   :  { %745 = vmatprep.subr.mxu1 %v138_v50  ;;  %712 = vmatprep.subr.mxu0 %v105_v51  ;;  %v183_v15 = vld [vmem:[#allocation5 + $0x300] sm:$0xff]  ;;  %v86_v18 = vld [vmem:[#allocation2 + $0x30] sm:$0xff]  ;;  %v177_v19 = vld [vmem:[#allocation5 + $0x2d0] sm:$0xff] }
  0x4f   :  { %746 = vmatpush3.msra.mxu1 %v122_v52  ;;  %713 = vmatpush3.msra.mxu0 %v89_v53  ;;  %v161_v20 = vld [vmem:[#allocation5 + $0x250] sm:$0xff]  ;;  %v176_v21 = vld [vmem:[#allocation5 + $0x2c8] sm:$0xff]  ;;  %v175_v23 = vld [vmem:[#allocation5 + $0x2c0] sm:$0xff] }
  0x50   :  { %747 = vmatprep.subr.mxu1 %v137_v54  ;;  %714 = vmatprep.subr.mxu0 %v104_v55  ;;  %v160_v22 = vld [vmem:[#allocation5 + $0x248] sm:$0xff]  ;;  %v159_v24 = vld [vmem:[#allocation5 + $0x240] sm:$0xff]  ;;  %v174_v25 = vld [vmem:[#allocation5 + $0x2b8] sm:$0xff] }
  0x51   :  { %748 = vmatpush3.msra.mxu1 %v121_v56  ;;  %715 = vmatpush3.msra.mxu0 %v88_v57  ;;  %v158_v26 = vld [vmem:[#allocation5 + $0x238] sm:$0xff]  ;;  %v173_v27 = vld [vmem:[#allocation5 + $0x2b0] sm:$0xff]  ;;  %v172_v29 = vld [vmem:[#allocation5 + $0x2a8] sm:$0xff] }
  0x52   :  { %749 = vmatprep.subr.mxu1 %v136_v58  ;;  %716 = vmatprep.subr.mxu0 %v103_v59  ;;  %v157_v28 = vld [vmem:[#allocation5 + $0x230] sm:$0xff]  ;;  %v156_v30 = vld [vmem:[#allocation5 + $0x228] sm:$0xff]  ;;  %v171_v31 = vld [vmem:[#allocation5 + $0x2a0] sm:$0xff] }
  0x53   :  { %260 = vmatprep.mubr.f32.mxu0 %v81_v60  ;;  %717 = vmatpush3.msra.mxu0 %v87_v61  ;;  %v155_v32 = vld [vmem:[#allocation5 + $0x220] sm:$0xff]  ;;  %v170_v33 = vld [vmem:[#allocation5 + $0x298] sm:$0xff]  ;;  %v169_v35 = vld [vmem:[#allocation5 + $0x290] sm:$0xff] }
  0x54   :  { %750 = vmatpush3.msra.mxu1 %v120_v62  ;;  %261 = vmatmul.mubr.f32.vlgmr.msra.gmra.mxu0 %v80_v63  ;;  %v154_v34 = vld [vmem:[#allocation5 + $0x218] sm:$0xff]  ;;  %v153_v36 = vld [vmem:[#allocation5 + $0x210] sm:$0xff]  ;;  %v168_v37 = vld [vmem:[#allocation5 + $0x288] sm:$0xff] }
  0x55   :  { %751 = vmatprep.subr.mxu1 %v135_v0  ;;  %756 = vmatprep.subr.mxu0 %v182_v1  ;;  %v152_v38 = vld [vmem:[#allocation5 + $0x208] sm:$0xff]  ;;  %v167_v39 = vld [vmem:[#allocation5 + $0x280] sm:$0xff]  ;;  %v490_v44 = vld [vmem:[#allocation7 + $0x68] sm:$0xff] }
  0x56   :  { %752 = vmatpush3.msra.mxu1 %v119_v2  ;;  %330 = vmatprep.mubr.f32.mxu1 %v83_v3  ;;  %v151_v40 = vld [vmem:[#allocation5 + $0x200] sm:$0xff]  ;;  %v84_v41 = vld [vmem:[#allocation2 + $0x20] sm:$0xff]  ;;  %v489_v45 = vld [vmem:[#allocation7 + $0x60] sm:$0xff] }
  0x57   :  { %757 = vmatpush3.msra.mxu0 %v166_v4  ;;  %331 = vmatmul.mubr.f32.vlgmr.msra.gmra.mxu1 %v82_v5  ;;  %v492_v42 = vld [vmem:[#allocation7 + $0x78] sm:$0xff]  ;;  %v491_v43 = vld [vmem:[#allocation7 + $0x70] sm:$0xff]  ;;  %v486_v48 = vld [vmem:[#allocation7 + $0x48] sm:$0xff] }
  0x58   :  { %758 = vmatprep.subr.mxu0 %v181_v6  ;;  %400 = vmatprep.mubr.f32.mxu0 %v85_v8  ;;  %v488_v46 = vld [vmem:[#allocation7 + $0x58] sm:$0xff]  ;;  %v487_v47 = vld [vmem:[#allocation7 + $0x50] sm:$0xff]  ;;  %v485_v49 = vld [vmem:[#allocation7 + $0x40] sm:$0xff] }
  0x59   :  { %759 = vmatpush3.msra.mxu0 %v165_v7  ;;  %828 = vmatprep.subr.mxu1 %v1028_v14  ;;  %v484_v50 = vld [vmem:[#allocation7 + $0x38] sm:$0xff]  ;;  %v483_v51 = vld [vmem:[#allocation7 + $0x30] sm:$0xff]  ;;  %v482_v52 = vld [vmem:[#allocation7 + $0x28] sm:$0xff] }
  0x5a   :  { %760 = vmatprep.subr.mxu0 %v180_v9  ;;  %829 = vmatpush3.msra.mxu1 %v184_v11  ;;  %v481_v53 = vld [vmem:[#allocation7 + $0x20] sm:$0xff]  ;;  %v480_v54 = vld [vmem:[#allocation7 + $0x18] sm:$0xff]  ;;  %v479_v55 = vld [vmem:[#allocation7 + $0x10] sm:$0xff] }
  0x5b   :  { %761 = vmatpush3.msra.mxu0 %v164_v10  ;;  %830 = vmatprep.subr.mxu1 %v1028_v14  ;;  %v478_v56 = vld [vmem:[#allocation7 + $0x8] sm:$0xff]  ;;  %v477_v57 = vld [vmem:[#allocation7] sm:$0xff]  ;;  %v586_v58 = vld [vmem:[#allocation8 + $0x78] sm:$0xff] }
  0x5c   :  { %762 = vmatprep.subr.mxu0 %v179_v12  ;;  %831 = vmatpush3.msra.mxu1 %v183_v15  ;;  %v585_v59 = vld [vmem:[#allocation8 + $0x70] sm:$0xff]  ;;  %v584_v60 = vld [vmem:[#allocation8 + $0x68] sm:$0xff]  ;;  %v583_v61 = vld [vmem:[#allocation8 + $0x60] sm:$0xff] }
  0x5d   :  { %763 = vmatpush3.msra.mxu0 %v163_v13  ;;  %832 = vmatprep.mubr.msk.f32.mxu1 %vm1029_vm1, %v1028_v14  ;;  %v582_v62 = vld [vmem:[#allocation8 + $0x58] sm:$0xff]  ;;  %v581_v63 = vld [vmem:[#allocation8 + $0x50] sm:$0xff]  ;;  %v580_v0 = vld [vmem:[#allocation8 + $0x48] sm:$0xff] }
  0x5e   :  { %764 = vmatprep.subr.mxu0 %v178_v16  ;;  %833 = vmatmul.mubr.msk.f32.vlgmr.msra.gmra.mxu1 %vm192_vm0, %v86_v18  ;;  %v579_v1 = vld [vmem:[#allocation8 + $0x40] sm:$0xff]  ;;  %v578_v2 = vld [vmem:[#allocation8 + $0x38] sm:$0xff]  ;;  %v577_v3 = vld [vmem:[#allocation8 + $0x30] sm:$0xff] }
  0x5f   :  { %765 = vmatpush3.msra.mxu0 %v162_v17  ;;  %835 = vmatprep.subr.mxu1 %v1028_v14  ;;  %v576_v4 = vld [vmem:[#allocation8 + $0x28] sm:$0xff]  ;;  %v575_v5 = vld [vmem:[#allocation8 + $0x20] sm:$0xff]  ;;  %v574_v6 = vld [vmem:[#allocation8 + $0x18] sm:$0xff] }
  0x60   :  { %766 = vmatprep.subr.mxu0 %v177_v19  ;;  %867 = vmatprep.mubr.msk.f32.mxu1 %vm1029_vm1, %v1028_v14  ;;  %v682_v15 = vld [vmem:[%s1146_s2] ss:$0 sm:$0xff] }
  0x61   :  { %767 = vmatpush3.msra.mxu0 %v161_v20  ;;  %836 = vmatpush3.msra.mxu1 %v492_v42 }
  0x62   :  { %768 = vmatprep.subr.mxu0 %v176_v21  ;;  %837 = vmatprep.subr.mxu1 %v1028_v14 }
  0x63   :  { %769 = vmatpush3.msra.mxu0 %v160_v22  ;;  %838 = vmatpush3.msra.mxu1 %v491_v43 }
  0x64   :  { %770 = vmatprep.subr.mxu0 %v175_v23  ;;  %839 = vmatprep.subr.mxu1 %v1028_v14 }
  0x65   :  { %771 = vmatpush3.msra.mxu0 %v159_v24  ;;  %840 = vmatpush3.msra.mxu1 %v490_v44 }
  0x66   :  { %772 = vmatprep.subr.mxu0 %v174_v25  ;;  %841 = vmatprep.subr.mxu1 %v1028_v14  ;;  %v573_v25 = vld [vmem:[#allocation8 + $0x10] sm:$0xff] }
  0x67   :  { %773 = vmatpush3.msra.mxu0 %v158_v26  ;;  %842 = vmatpush3.msra.mxu1 %v489_v45  ;;  %v572_v26 = vld [vmem:[#allocation8 + $0x8] sm:$0xff] }
  0x68   :  { %774 = vmatprep.subr.mxu0 %v173_v27  ;;  %843 = vmatprep.subr.mxu1 %v1028_v14  ;;  %v571_v27 = vld [vmem:[#allocation8] sm:$0xff] }
  0x69   :  { %775 = vmatpush3.msra.mxu0 %v157_v28  ;;  %844 = vmatpush3.msra.mxu1 %v488_v46  ;;  %v684_v28 = vld [vmem:[%s1148_s4] ss:$0 sm:$0xff] }
  0x6a   :  { %776 = vmatprep.subr.mxu0 %v172_v29  ;;  %845 = vmatprep.subr.mxu1 %v1028_v14 }
  0x6b   :  { %777 = vmatpush3.msra.mxu0 %v156_v30  ;;  %846 = vmatpush3.msra.mxu1 %v487_v47 }
  0x6c   :  { %778 = vmatprep.subr.mxu0 %v171_v31  ;;  %847 = vmatprep.subr.mxu1 %v1028_v14 }
  0x6d   :  { %779 = vmatpush3.msra.mxu0 %v155_v32  ;;  %848 = vmatpush3.msra.mxu1 %v486_v48 }
  0x6e   :  { %780 = vmatprep.subr.mxu0 %v170_v33  ;;  %849 = vmatprep.subr.mxu1 %v1028_v14  ;;  %v685_v33 = vld [vmem:[%s1150_s6] ss:$0 sm:$0xff] }
  0x6f   :  { %781 = vmatpush3.msra.mxu0 %v154_v34  ;;  %850 = vmatpush3.msra.mxu1 %v485_v49 }
  0x70   :  { %782 = vmatprep.subr.mxu0 %v169_v35  ;;  %851 = vmatprep.subr.mxu1 %v1028_v14 }
  0x71   :  { %783 = vmatpush3.msra.mxu0 %v153_v36  ;;  %852 = vmatpush3.msra.mxu1 %v484_v50 }
  0x72   :  { %784 = vmatprep.subr.mxu0 %v168_v37  ;;  %853 = vmatprep.subr.mxu1 %v1028_v14 }
  0x73   :  { %785 = vmatpush3.msra.mxu0 %v152_v38  ;;  %854 = vmatpush3.msra.mxu1 %v483_v51 }
  0x74   :  { %786 = vmatprep.subr.mxu0 %v167_v39  ;;  %855 = vmatprep.subr.mxu1 %v1028_v14 }
  0x75   :  { %787 = vmatpush3.msra.mxu0 %v151_v40  ;;  %856 = vmatpush3.msra.mxu1 %v482_v52 }
  0x76   :  { %401 = vmatmul.mubr.f32.vlgmr.msra.gmra.mxu0 %v84_v41  ;;  %870 = vmatprep.subr.mxu0 %v1028_v14 }
  0x77   :  { %902 = vmatprep.mubr.msk.f32.mxu0 %vm1029_vm1, %v1028_v14  ;;  %857 = vmatprep.subr.mxu1 %v1028_v14 }
  0x78   :  { %858 = vmatpush3.msra.mxu1 %v481_v53  ;;  %871 = vmatpush3.msra.mxu0 %v586_v58 }
  0x79   :  { %859 = vmatprep.subr.mxu1 %v1028_v14  ;;  %872 = vmatprep.subr.mxu0 %v1028_v14 }
  0x7a   :  { %860 = vmatpush3.msra.mxu1 %v480_v54  ;;  %873 = vmatpush3.msra.mxu0 %v585_v59 }
  0x7b   :  { %861 = vmatprep.subr.mxu1 %v1028_v14  ;;  %874 = vmatprep.subr.mxu0 %v1028_v14 }
  0x7c   :  { %862 = vmatpush3.msra.mxu1 %v479_v55  ;;  %875 = vmatpush3.msra.mxu0 %v584_v60 }
  0x7d   :  { %863 = vmatprep.subr.mxu1 %v1028_v14  ;;  %876 = vmatprep.subr.mxu0 %v1028_v14 }
  0x7e   :  { %864 = vmatpush3.msra.mxu1 %v478_v56  ;;  %877 = vmatpush3.msra.mxu0 %v583_v61 }
  0x7f   :  { %865 = vmatprep.subr.mxu1 %v1028_v14  ;;  %878 = vmatprep.subr.mxu0 %v1028_v14 }
  0x80   :  { %866 = vmatpush3.msra.mxu1 %v477_v57  ;;  %879 = vmatpush3.msra.mxu0 %v582_v62 }
  0x81   :  { %880 = vmatprep.subr.mxu0 %v1028_v14 }
  0x82   :  { %881 = vmatpush3.msra.mxu0 %v581_v63 }
  0x83   :  { %882 = vmatprep.subr.mxu0 %v1028_v14 }
  0x84   :  { %883 = vmatpush3.msra.mxu0 %v580_v0 }
  0x85   :  { %884 = vmatprep.subr.mxu0 %v1028_v14 }
  0x86   :  { %885 = vmatpush3.msra.mxu0 %v579_v1 }
  0x87   :  { %886 = vmatprep.subr.mxu0 %v1028_v14 }
  0x88   :  { %887 = vmatpush3.msra.mxu0 %v578_v2 }
  0x89   :  { %888 = vmatprep.subr.mxu0 %v1028_v14 }
  0x8a   :  { %889 = vmatpush3.msra.mxu0 %v577_v3 }
  0x8b   :  { %890 = vmatprep.subr.mxu0 %v1028_v14 }
  0x8c   :  { %891 = vmatpush3.msra.mxu0 %v576_v4 }
  0x8d   :  { %892 = vmatprep.subr.mxu0 %v1028_v14 }
  0x8e   :  { %893 = vmatpush3.msra.mxu0 %v575_v5 }
  0x8f   :  { %894 = vmatprep.subr.mxu0 %v1028_v14 }
  0x90   :  { %895 = vmatpush3.msra.mxu0 %v574_v6 }
  0x91   :  { %896 = vmatprep.subr.mxu0 %v1028_v14 }
  0x92   :  { %897 = vmatpush3.msra.mxu0 %v573_v25 }
  0x93   :  { %898 = vmatprep.subr.mxu0 %v1028_v14 }
  0x94   :  { %899 = vmatpush3.msra.mxu0 %v572_v26 }
  0x95   :  { %900 = vmatprep.subr.mxu0 %v1028_v14 }
  0x96   :  { %901 = vmatpush3.msra.mxu0 %v571_v27 }
 0x114   :  { %v718_v11 = vpop.f32.mrf.mxu0 }
 0x116   :  { %v719_v12 = vpop.f32.mrf.mxu0 }
 0x117   :  { %v753_v7 = vpop.f32.mrf.mxu1  ;;  %v720_v13 = vadd.f32 %v719_v12, %v718_v11 }
 0x119   :  { %v754_v8 = vpop.f32.mrf.mxu1  ;;  %v263_v16 = vadd.f32 %v720_v13, %v682_v15 }
 0x11a   :  { %v755_v17 = vadd.f32 %v754_v8, %v753_v7 }
 0x11c   :  { %v333_v20 = vadd.f32 %v755_v17, %v263_v16 }
 0x11e   :  { %v472_v9 = vpop.f32.mrf.mxu1 }
 0x120   :  { %v834_v10 = vpop.f32.mrf.mxu1 }
 0x136   :  { %v788_v18 = vpop.f32.mrf.mxu0 }
 0x138   :  { %v789_v19 = vpop.f32.mrf.mxu0 }
 0x139   :  { %v790_v21 = vadd.f32 %v789_v19, %v788_v18 }
 0x13b   :  { %v403_v22 = vadd.f32 %v790_v21, %v333_v20 }
 0x13d   :  { %v473_v23 = vadd.f32 %v472_v9, %v403_v22 }
 0x13f   :  { %v476_v24 = vmax.f32 %v473_v23, 0.0 }
 0x141   :  { %868 = vmatmul.mubr.f32.vlgmr.msra.gmra.mxu1 %v476_v24 }
 0x201   :  { %v566_v29 = vpop.f32.mrf.mxu1 }
 0x202   :  { %v567_v30 = vadd.f32 %v684_v28, %v566_v29 }
 0x203   :  { %v869_v31 = vpop.f32.mrf.mxu1 }
 0x204   :  { %v570_v32 = vmax.f32 %v567_v30, 0.0 }
 0x206   :  { %903 = vmatmul.mubr.f32.vlgmr.msra.gmra.mxu0 %v570_v32 }
 0x2c6   :  { %v660_v34 = vpop.f32.mrf.mxu0 }
 0x2c7   :  { %v661_v35 = vadd.f32 %v685_v33, %v660_v34 }
 0x2c8   :  { %v904_v14 = vpop.f32.mrf.mxu0 }
 0x2c9   :  { %664 = vst [vmem:[#allocation10] sm:$0xff] %v661_v35 }
 0x2ca   :  { %1005 = shalt.err (!%p1002_p10)
}
 0x2cb   :  { %674 = dma.vmem_to_hbm [thread:$0]  %s672_s25, 128, %s1151_s7, [#allocation4]  }
 0x2cc   :  { %1020 = dma.done.wait [#allocation4], 128  }
 0x2cd   :  { %1021 = vsyncadd [#allocation4], 4294967168 }
 0x2ce   :  { %678 = vsyncpa [#allocation3], 1 }
 0x2cf   :  { %679 = vsyncpa [#allocation6], 1 }
 0x2d0   :  { %680 = vsyncpa [#allocation9], 1 }
 0x2d1   :  { %681 = vsyncpa [#allocation4], 1 }

</bundles_post_ra>
